<compile_context>
chip_gen: v7x
topology: tpu7x:2x2x1
jax: 0.10.0
libtpu: 0.0.40
codegen_flags: <defaults>
</compile_context>

<pallas_src>
import jax
import jax.numpy as jnp
from jax import lax
from jax.experimental import pallas as pl
from jax.experimental.pallas import tpu as pltpu

# Module hyper-parameters (match AffinityLayer_Edge(32, 32, 4, is_concat=True)).
IN_FEATURES = 32
OUT_FEATURES = 32
N_HEADS = 4
IS_CONCAT = True
N_HIDDEN = OUT_FEATURES // N_HEADS if IS_CONCAT else OUT_FEATURES   # = 8
HD = N_HEADS * N_HIDDEN                                             # = 32
NEG_SLOPE = 0.2

# Problem sizes (small, consistent with the module).
BATCH = 2
N_NODES = 128        # keeps the output lane dim a multiple of 128
N_EDGES = 64


def _leaky_relu(x):
    return jnp.where(x >= 0.0, x, NEG_SLOPE * x)


def _affinity_edge_kernel(xv_ref, xe_ref, wv_ref, we_ref, scale_ref, out_ref):
    """Computes the full [B, M, N] edge-vertex affinity in one grid step.

    xv_ref   : [B*N, F]   batch-flattened node features (VMEM)
    xe_ref   : [B*M, F]   batch-flattened edge features (VMEM)
    wv_ref   : [F, H*D]   linear_vert weight, transposed (VMEM)
    we_ref   : [F, H*D]   linear_edge weight, transposed (VMEM)
    scale_ref: [H, H*D]   W_attn[j, h] broadcast over the D hidden dims of head h
    out_ref  : [B, M, N]  output block (VMEM)
    """
    b, m, n = out_ref.shape
    h, hd = scale_ref.shape

    # Projections for all batches at once (two small MXU matmuls, K = F).
    g_v = jnp.dot(xv_ref[...], wv_ref[...], preferred_element_type=jnp.float32)  # [B*N, HD]
    g_e = jnp.dot(xe_ref[...], we_ref[...], preferred_element_type=jnp.float32)  # [B*M, HD]
    scale = scale_ref[...]                                                        # [H, HD]

    for bi in range(b):                     # unrolled, b == 2
        gv_b = g_v[bi * n:(bi + 1) * n]     # [N, HD]   sublane-aligned slice
        ge_b = g_e[bi * m:(bi + 1) * m]     # [M, HD]   sublane-aligned slice

        # Fold W_attn into the matmul LHS for ALL heads at once:
        #   stacked[j*M + mm, k] = W_attn[j, k // D] * g_e[mm, k]
        # One broadcast-multiply instead of H separate ones.
        stacked = (scale[:, None, :] * ge_b[None, :, :]).reshape(h * m, hd)       # [H*M, HD]

        # Single K=HD contraction replaces H per-head matmuls + weighted combine.
        aff = lax.dot_general(
            stacked, gv_b,
            dimension_numbers=(((1,), (1,)), ((), ())),
            preferred_element_type=jnp.float32,
        )                                                                         # [H*M, N]

        act = _leaky_relu(aff)

        # Sum over heads: 64-row sublane-aligned slabs, plain VPU adds.
        # (If vreg pressure ever shows spills, process in two [2*M, N] halves.)
        res = act[0:m]
        for j in range(1, h):
            res = res + act[j * m:(j + 1) * m]

        out_ref[bi] = res


def affinity_layer_edge(vertex, edge, w_vert, w_edge, w_attn):
    """vertex: [B, N, F]; edge: [B, M, F]; w_*: [H*D, F] (torch Linear layout);
    w_attn: [H, H]."""
    b, n, f = vertex.shape
    m = edge.shape[1]
    hd = w_vert.shape[0]
    h = w_attn.shape[0]

    xv = jnp.asarray(vertex, jnp.float32).reshape(b * n, f)    # [B*N, F]
    xe = jnp.asarray(edge, jnp.float32).reshape(b * m, f)      # [B*M, F]
    wv_t = jnp.asarray(w_vert, jnp.float32).T                  # [F, H*D]
    we_t = jnp.asarray(w_edge, jnp.float32).T                  # [F, H*D]
    # scale[j, hh*D + d] = W_attn[j, hh]  (precomputed in the wrapper).
    scale = jnp.repeat(jnp.asarray(w_attn, jnp.float32), hd // h, axis=1)  # [H, H*D]

    flops = (2 * (b * n) * f * hd            # vertex projection
             + 2 * (b * m) * f * hd          # edge projection
             + b * 2 * (h * m) * hd * n)     # stacked affinity matmuls
    bytes_accessed = 4 * (b * n * f + b * m * f + 2 * f * hd + h * hd + b * m * n)

    return pl.pallas_call(
        _affinity_edge_kernel,
        out_shape=jax.ShapeDtypeStruct((b, m, n), jnp.float32),
        grid_spec=pltpu.PrefetchScalarGridSpec(
            num_scalar_prefetch=0,
            grid=(1,),                                           # single step: no per-step overhead
            in_specs=[
                pl.BlockSpec((b * n, f), lambda i: (0, 0)),      # vertex (flattened)
                pl.BlockSpec((b * m, f), lambda i: (0, 0)),      # edge (flattened)
                pl.BlockSpec((f, hd), lambda i: (0, 0)),         # W_vert^T
                pl.BlockSpec((f, hd), lambda i: (0, 0)),         # W_edge^T
                pl.BlockSpec((h, hd), lambda i: (0, 0)),         # attn scales
            ],
            out_specs=pl.BlockSpec((b, m, n), lambda i: (0, 0, 0)),
        ),
        compiler_params=pltpu.CompilerParams(
            dimension_semantics=("arbitrary",),
        ),
        cost_estimate=pl.CostEstimate(
            flops=flops, transcendentals=0, bytes_accessed=bytes_accessed),
    )(xv, xe, wv_t, we_t, scale)


def _reference(vertex, edge, w_vert, w_edge, w_attn):
    """Pure-JAX reference mirroring the PyTorch forward."""
    b, n, _ = vertex.shape
    m = edge.shape[1]
    gv = (vertex @ w_vert.T).reshape(b, n, N_HEADS, N_HIDDEN)
    ge = (edge @ w_edge.T).reshape(b, m, N_HEADS, N_HIDDEN)
    s = jnp.einsum("bmhd,bnhd->bmnh", ge, gv)          # per-head affinity
    e = jnp.einsum("bmnh,jh->bmnj", s, w_attn)         # attn Linear (no bias)
    e = jnp.where(e >= 0.0, e, NEG_SLOPE * e)          # LeakyReLU(0.2)
    return e.sum(axis=-1)                              # squeeze(-1) is a no-op; sum heads


if __name__ == "__main__":
    key = jax.random.PRNGKey(0)
    k_v, k_e, k_wv, k_we, k_wa = jax.random.split(key, 5)

    vertex = jax.random.normal(k_v, (BATCH, N_NODES, IN_FEATURES), dtype=jnp.float32)
    edge = jax.random.normal(k_e, (BATCH, N_EDGES, IN_FEATURES), dtype=jnp.float32)
    # Deterministic "parameters" (shapes follow the module's __init__).
    w_vert = jax.random.normal(k_wv, (HD, IN_FEATURES),
                               dtype=jnp.float32) * (1.0 / IN_FEATURES ** 0.5)
    w_edge = jax.random.normal(k_we, (HD, IN_FEATURES),
                               dtype=jnp.float32) * (1.0 / IN_FEATURES ** 0.5)
    w_attn = jax.random.normal(k_wa, (N_HEADS, N_HEADS),
                               dtype=jnp.float32) * (1.0 / N_HEADS ** 0.5)
    # TODO(synk): the module's softmax / dropout members are never used in forward.

    out = affinity_layer_edge(vertex, edge, w_vert, w_edge, w_attn)
    out = jax.block_until_ready(out)

    ref = _reference(vertex, edge, w_vert, w_edge, w_attn)
    assert out.shape == (BATCH, N_EDGES, N_NODES)
    assert jnp.allclose(out, ref, atol=2e-3, rtol=2e-3), "mismatch vs reference"

    print("KERNEL_OK")
</pallas_src>

<mosaic_0001>
module attributes {stable_mosaic.version = 11 : i64} {
  func.func @_affinity_edge_kernel(%arg0: i32, %arg1: memref<256x32xf32, #tpu.memory_space<vmem>>, %arg2: memref<128x32xf32, #tpu.memory_space<vmem>>, %arg3: memref<32x32xf32, #tpu.memory_space<vmem>>, %arg4: memref<32x32xf32, #tpu.memory_space<vmem>>, %arg5: memref<4x32xf32, #tpu.memory_space<vmem>>, %arg6: memref<2x64x128xf32, #tpu.memory_space<vmem>>) attributes {dimension_semantics = [#tpu.dimension_semantics<arbitrary>], iteration_bounds = array<i64: 1>, scalar_prefetch = 0 : i64, scratch_operands = 0 : i64, tpu.core_type = #tpu.core_type<tc>, window_params = [{pipeline_mode = #tpu.pipeline_mode<synchronous>, transform_indices = @transform_0, window_bounds = array<i64: 256, 32>}, {pipeline_mode = #tpu.pipeline_mode<synchronous>, transform_indices = @transform_1, window_bounds = array<i64: 128, 32>}, {pipeline_mode = #tpu.pipeline_mode<synchronous>, transform_indices = @transform_2, window_bounds = array<i64: 32, 32>}, {pipeline_mode = #tpu.pipeline_mode<synchronous>, transform_indices = @transform_3, window_bounds = array<i64: 32, 32>}, {pipeline_mode = #tpu.pipeline_mode<synchronous>, transform_indices = @transform_4, window_bounds = array<i64: 4, 32>}, {pipeline_mode = #tpu.pipeline_mode<synchronous>, transform_indices = @transform_5, window_bounds = array<i64: 2, 64, 128>}]} {
    %c0 = arith.constant 0 : index
    %c0_0 = arith.constant 0 : index
    %0 = vector.load %arg1[%c0, %c0_0] : memref<256x32xf32, #tpu.memory_space<vmem>>, vector<256x32xf32>
    %c0_1 = arith.constant 0 : index
    %c0_2 = arith.constant 0 : index
    %1 = vector.load %arg3[%c0_1, %c0_2] : memref<32x32xf32, #tpu.memory_space<vmem>>, vector<32x32xf32>
    %cst = arith.constant dense<0.000000e+00> : vector<256x32xf32>
    %2 = tpu.matmul %0, %1, %cst {dimension_numbers = #tpu.dot_dimension_numbers<[1], [0], [0], [1], [0, 0, 1, 1], [], []>} : vector<256x32xf32>, vector<32x32xf32>, vector<256x32xf32> -> vector<256x32xf32>
    %c0_3 = arith.constant 0 : index
    %c0_4 = arith.constant 0 : index
    %3 = vector.load %arg2[%c0_3, %c0_4] : memref<128x32xf32, #tpu.memory_space<vmem>>, vector<128x32xf32>
    %c0_5 = arith.constant 0 : index
    %c0_6 = arith.constant 0 : index
    %4 = vector.load %arg4[%c0_5, %c0_6] : memref<32x32xf32, #tpu.memory_space<vmem>>, vector<32x32xf32>
    %cst_7 = arith.constant dense<0.000000e+00> : vector<128x32xf32>
    %5 = tpu.matmul %3, %4, %cst_7 {dimension_numbers = #tpu.dot_dimension_numbers<[1], [0], [0], [1], [0, 0, 1, 1], [], []>} : vector<128x32xf32>, vector<32x32xf32>, vector<128x32xf32> -> vector<128x32xf32>
    %c0_8 = arith.constant 0 : index
    %c0_9 = arith.constant 0 : index
    %6 = vector.load %arg5[%c0_8, %c0_9] : memref<4x32xf32, #tpu.memory_space<vmem>>, vector<4x32xf32>
    %7 = vector.extract_strided_slice %2 {offsets = [0, 0], sizes = [128, 32], strides = [1, 1]} : vector<256x32xf32> to vector<128x32xf32>
    %8 = vector.extract_strided_slice %5 {offsets = [0, 0], sizes = [64, 32], strides = [1, 1]} : vector<128x32xf32> to vector<64x32xf32>
    %9 = vector.shape_cast %6 : vector<4x32xf32> to vector<4x1x32xf32>
    %10 = vector.shape_cast %8 : vector<64x32xf32> to vector<1x64x32xf32>
    %11 = vector.broadcast %9 : vector<4x1x32xf32> to vector<4x64x32xf32>
    %12 = vector.broadcast %10 : vector<1x64x32xf32> to vector<4x64x32xf32>
    %13 = arith.mulf %11, %12 : vector<4x64x32xf32>
    %14 = vector.shape_cast %13 : vector<4x64x32xf32> to vector<256x32xf32>
    %cst_10 = arith.constant dense<0.000000e+00> : vector<256x128xf32>
    %15 = tpu.matmul %14, %7, %cst_10 {dimension_numbers = #tpu.dot_dimension_numbers<[1], [1], [0], [0], [0, 0, 1, 0], [], []>} : vector<256x32xf32>, vector<128x32xf32>, vector<256x128xf32> -> vector<256x128xf32>
    %cst_11 = arith.constant 0.000000e+00 : f32
    %16 = vector.broadcast %cst_11 : f32 to vector<256x128xf32>
    %17 = arith.cmpf oge, %15, %16 : vector<256x128xf32>
    %cst_12 = arith.constant 2.000000e-01 : f32
    %18 = vector.broadcast %cst_12 : f32 to vector<256x128xf32>
    %19 = arith.mulf %18, %15 : vector<256x128xf32>
    %20 = arith.select %17, %15, %19 : vector<256x128xi1>, vector<256x128xf32>
    %21 = vector.extract_strided_slice %20 {offsets = [0, 0], sizes = [64, 128], strides = [1, 1]} : vector<256x128xf32> to vector<64x128xf32>
    %22 = vector.extract_strided_slice %20 {offsets = [64, 0], sizes = [64, 128], strides = [1, 1]} : vector<256x128xf32> to vector<64x128xf32>
    %23 = arith.addf %21, %22 : vector<64x128xf32>
    %24 = vector.extract_strided_slice %20 {offsets = [128, 0], sizes = [64, 128], strides = [1, 1]} : vector<256x128xf32> to vector<64x128xf32>
    %25 = arith.addf %23, %24 : vector<64x128xf32>
    %26 = vector.extract_strided_slice %20 {offsets = [192, 0], sizes = [64, 128], strides = [1, 1]} : vector<256x128xf32> to vector<64x128xf32>
    %27 = arith.addf %25, %26 : vector<64x128xf32>
    %c0_13 = arith.constant 0 : index
    %c0_14 = arith.constant 0 : index
    %c0_15 = arith.constant 0 : index
    %28 = vector.load %arg6[%c0_13, %c0_14, %c0_15] : memref<2x64x128xf32, #tpu.memory_space<vmem>>, vector<1x64x128xf32>
    %29 = vector.shape_cast %28 : vector<1x64x128xf32> to vector<64x128xf32>
    %30 = vector.shape_cast %27 : vector<64x128xf32> to vector<1x64x128xf32>
    tpu.vector_store %arg6[%c0_13, %c0_14, %c0_15], %30 {strides = array<i32>} : memref<2x64x128xf32, #tpu.memory_space<vmem>>, vector<1x64x128xf32>,
    %31 = vector.extract_strided_slice %2 {offsets = [128, 0], sizes = [128, 32], strides = [1, 1]} : vector<256x32xf32> to vector<128x32xf32>
    %32 = vector.extract_strided_slice %5 {offsets = [64, 0], sizes = [64, 32], strides = [1, 1]} : vector<128x32xf32> to vector<64x32xf32>
    %33 = vector.shape_cast %6 : vector<4x32xf32> to vector<4x1x32xf32>
    %34 = vector.shape_cast %32 : vector<64x32xf32> to vector<1x64x32xf32>
    %35 = vector.broadcast %33 : vector<4x1x32xf32> to vector<4x64x32xf32>
    %36 = vector.broadcast %34 : vector<1x64x32xf32> to vector<4x64x32xf32>
    %37 = arith.mulf %35, %36 : vector<4x64x32xf32>
    %38 = vector.shape_cast %37 : vector<4x64x32xf32> to vector<256x32xf32>
    %cst_16 = arith.constant dense<0.000000e+00> : vector<256x128xf32>
    %39 = tpu.matmul %38, %31, %cst_16 {dimension_numbers = #tpu.dot_dimension_numbers<[1], [1], [0], [0], [0, 0, 1, 0], [], []>} : vector<256x32xf32>, vector<128x32xf32>, vector<256x128xf32> -> vector<256x128xf32>
    %cst_17 = arith.constant 0.000000e+00 : f32
    %40 = vector.broadcast %cst_17 : f32 to vector<256x128xf32>
    %41 = arith.cmpf oge, %39, %40 : vector<256x128xf32>
    %cst_18 = arith.constant 2.000000e-01 : f32
    %42 = vector.broadcast %cst_18 : f32 to vector<256x128xf32>
    %43 = arith.mulf %42, %39 : vector<256x128xf32>
    %44 = arith.select %41, %39, %43 : vector<256x128xi1>, vector<256x128xf32>
    %45 = vector.extract_strided_slice %44 {offsets = [0, 0], sizes = [64, 128], strides = [1, 1]} : vector<256x128xf32> to vector<64x128xf32>
    %46 = vector.extract_strided_slice %44 {offsets = [64, 0], sizes = [64, 128], strides = [1, 1]} : vector<256x128xf32> to vector<64x128xf32>
    %47 = arith.addf %45, %46 : vector<64x128xf32>
    %48 = vector.extract_strided_slice %44 {offsets = [128, 0], sizes = [64, 128], strides = [1, 1]} : vector<256x128xf32> to vector<64x128xf32>
    %49 = arith.addf %47, %48 : vector<64x128xf32>
    %50 = vector.extract_strided_slice %44 {offsets = [192, 0], sizes = [64, 128], strides = [1, 1]} : vector<256x128xf32> to vector<64x128xf32>
    %51 = arith.addf %49, %50 : vector<64x128xf32>
    %c1 = arith.constant 1 : index
    %c0_19 = arith.constant 0 : index
    %c0_20 = arith.constant 0 : index
    %52 = vector.load %arg6[%c1, %c0_19, %c0_20] : memref<2x64x128xf32, #tpu.memory_space<vmem>>, vector<1x64x128xf32>
    %53 = vector.shape_cast %52 : vector<1x64x128xf32> to vector<64x128xf32>
    %54 = vector.shape_cast %51 : vector<64x128xf32> to vector<1x64x128xf32>
    tpu.vector_store %arg6[%c1, %c0_19, %c0_20], %54 {strides = array<i32>} : memref<2x64x128xf32, #tpu.memory_space<vmem>>, vector<1x64x128xf32>,
    return
  }
  func.func @transform_0(%arg0: i32) -> (i32, i32) {
    %c0_i32 = arith.constant 0 : i32
    %c0_i32_0 = arith.constant 0 : i32
    %c0_i32_1 = arith.constant 0 : i32
    return %c0_i32, %c0_i32_0 : i32, i32
  }
  func.func @transform_1(%arg0: i32) -> (i32, i32) {
    %c0_i32 = arith.constant 0 : i32
    %c0_i32_0 = arith.constant 0 : i32
    %c0_i32_1 = arith.constant 0 : i32
    return %c0_i32, %c0_i32_0 : i32, i32
  }
  func.func @transform_2(%arg0: i32) -> (i32, i32) {
    %c0_i32 = arith.constant 0 : i32
    %c0_i32_0 = arith.constant 0 : i32
    %c0_i32_1 = arith.constant 0 : i32
    return %c0_i32, %c0_i32_0 : i32, i32
  }
  func.func @transform_3(%arg0: i32) -> (i32, i32) {
    %c0_i32 = arith.constant 0 : i32
    %c0_i32_0 = arith.constant 0 : i32
    %c0_i32_1 = arith.constant 0 : i32
    return %c0_i32, %c0_i32_0 : i32, i32
  }
  func.func @transform_4(%arg0: i32) -> (i32, i32) {
    %c0_i32 = arith.constant 0 : i32
    %c0_i32_0 = arith.constant 0 : i32
    %c0_i32_1 = arith.constant 0 : i32
    return %c0_i32, %c0_i32_0 : i32, i32
  }
  func.func @transform_5(%arg0: i32) -> (i32, i32, i32) {
    %c0_i32 = arith.constant 0 : i32
    %c0_i32_0 = arith.constant 0 : i32
    %c0_i32_1 = arith.constant 0 : i32
    %c0_i32_2 = arith.constant 0 : i32
    return %c0_i32, %c0_i32_0, %c0_i32_1 : i32, i32, i32
  }
}

</mosaic_0001>

<bundles_post_ra>
// kernel: tpu_custom_call.1
= control target key start
LH: loop header
LB: loop body
LE: loop exit
PB: predicated region body
PF: predicated region fallthrough
CT: control target
= control target key end

     0   :  { %vm57_vm0 = vcmask 261120   ;;  %s3144_s0 = inlined_call_operand.vmem [shape: f32[256,32], index: 0, kind: input, shape index: {}]   ;;  %s3145_s1 = inlined_call_operand.vmem [shape: f32[128,32], index: 1, kind: input, shape index: {}]   ;;  %s3146_s2 = inlined_call_operand.vmem [shape: f32[32,32], index: 2, kind: input, shape index: {}]   ;;  %s3147_s3 = inlined_call_operand.vmem [shape: f32[32,32], index: 3, kind: input, shape index: {}]   ;;  %s3148_s4 = inlined_call_operand.vmem [shape: f32[4,32], index: 4, kind: input, shape index: {}]   ;;  %s3149_s5 = inlined_call_operand.hbm [shape: f32[2,64,128], index: 5, kind: output, shape index: {}]  }
   0x1   :  { %v53_v0 = vld [vmem:[%s3146_s2] sm:$0xff]  ;;  %v54_v1 = vld [vmem:[%s3146_s2 + $0x8] sm:$0xff]  ;;  %v55_v2 = vld [vmem:[%s3146_s2 + $0x10] sm:$0xff] }
   0x2   :  { %v2258_v3 = vpack.c.bf16 %v54_v1, %v53_v0  ;;  %v56_v4 = vld [vmem:[%s3146_s2 + $0x18] sm:$0xff]  ;;  %v21_v5 = vld [vmem:[%s3144_s0] sm:$0xff]  ;;  %v22_v7 = vld [vmem:[%s3144_s0 + $0x8] sm:$0xff] }
   0x3   :  { %v2262_v6 = vpack.c.bf16 %v56_v4, %v55_v2  ;;  %2018 = vmatprep.mubr.msk.f32.mxu0 %vm57_vm0, %v21_v5  ;;  %v23_v8 = vld [vmem:[%s3144_s0 + $0x10] sm:$0xff]  ;;  %v395_v9 = vld [vmem:[%s3147_s3] sm:$0xff]  ;;  %v396_v10 = vld [vmem:[%s3147_s3 + $0x8] sm:$0xff] }
   0x4   :  { %2259 = vmatprep.subr.bf16.mxu0 %v2258_v3  ;;  %v2266_v11 = vpack.c.bf16 %v396_v10, %v395_v9  ;;  %v397_v12 = vld [vmem:[%s3147_s3 + $0x10] sm:$0xff]  ;;  %v398_v13 = vld [vmem:[%s3147_s3 + $0x18] sm:$0xff]  ;;  %v379_v15 = vld [vmem:[%s3145_s1] sm:$0xff] }
   0x5   :  { %2261 = vmatpush3.bf16.msra.mxu0 %v2258_v3  ;;  %v2270_v14 = vpack.c.bf16 %v398_v13, %v397_v12  ;;  %v24_v16 = vld [vmem:[%s3144_s0 + $0x18] sm:$0xff]  ;;  %v25_v17 = vld [vmem:[%s3144_s0 + $0x20] sm:$0xff]  ;;  %2074 = vmatprep.mubr.msk.f32.mxu1 %vm57_vm0, %v379_v15  ;;  %v26_v18 = vld [vmem:[%s3144_s0 + $0x28] sm:$0xff] }
   0x6   :  { %2263 = vmatprep.subr.bf16.mxu0 %v2262_v6  ;;  %2267 = vmatprep.subr.bf16.mxu1 %v2266_v11  ;;  %v27_v19 = vld [vmem:[%s3144_s0 + $0x30] sm:$0xff]  ;;  %v380_v20 = vld [vmem:[%s3145_s1 + $0x8] sm:$0xff] }
   0x7   :  { %2269 = vmatpush3.bf16.msra.mxu1 %v2266_v11  ;;  %v381_v21 = vld [vmem:[%s3145_s1 + $0x10] sm:$0xff] }
   0x8   :  { %2271 = vmatprep.subr.bf16.mxu1 %v2270_v14 }
   0x9   :  { %2265 = vmatpush3.bf16.msra.mxu0 %v2262_v6 }
   0xb   :  { %2273 = vmatpush3.bf16.msra.mxu1 %v2270_v14 }
   0xc   :  { %2019 = vmatmul.mubr.msk.f32.vlgmr.msra.gmra.mrb[0].mxu0 %vm57_vm0, %v22_v7 }
   0xd   :  { %2021 = vmatprep.mubr.msk.f32.mxu0 %vm57_vm0, %v23_v8 }
  0x10   :  { %2022 = vmatmul.mubr.msk.f32.gmra.mrb[2].mxu0 %vm57_vm0, %v24_v16 }
  0x11   :  { %2024 = vmatprep.mubr.msk.f32.mxu0 %vm57_vm0, %v25_v17 }
  0x12   :  { %10 = vsyncpa [#allocation3], 0  ;;  %v28_v22 = vld [vmem:[%s3144_s0 + $0x38] sm:$0xff]  ;;  %2075 = vmatmul.mubr.msk.f32.vlgmr.msra.gmra.mrb[0].mxu1 %vm57_vm0, %v380_v20  ;;  %v29_v23 = vld [vmem:[%s3144_s0 + $0x40] sm:$0xff]  ;;  %v2398_v60 = vmov 1966171168   ;;  %v605_v62 = vlaneseq }
  0x13   :  { %2077 = vmatprep.mubr.msk.f32.mxu1 %vm57_vm0, %v381_v21  ;;  %v382_v24 = vld [vmem:[%s3145_s1 + $0x18] sm:$0xff]  ;;  %v383_v25 = vld [vmem:[%s3145_s1 + $0x20] sm:$0xff]  ;;  %v30_v26 = vld [vmem:[%s3144_s0 + $0x48] sm:$0xff]  ;;  %v603_v61 = vunpack.c.l.s4 %v2398_v60 }
  0x14   :  { %2025 = vmatmul.mubr.msk.f32.gmra.mrb[4].mxu0 %vm57_vm0, %v26_v18  ;;  %v31_v27 = vld [vmem:[%s3144_s0 + $0x50] sm:$0xff]  ;;  %v384_v28 = vld [vmem:[%s3145_s1 + $0x28] sm:$0xff]  ;;  %v32_v30 = vld [vmem:[%s3144_s0 + $0x58] sm:$0xff]  ;;  %v606_v0 = vshrl.u32 %v605_v62, 7 }
  0x15   :  { %2027 = vmatprep.mubr.msk.f32.mxu0 %vm57_vm0, %v27_v19  ;;  %v385_v29 = vld [vmem:[%s3145_s1 + $0x30] sm:$0xff]  ;;  %v33_v31 = vld [vmem:[%s3144_s0 + $0x60] sm:$0xff]  ;;  %v386_v32 = vld [vmem:[%s3145_s1 + $0x38] sm:$0xff]  ;;  %v604_v63 = vunpack.c.0.s8 %v603_v61 }
  0x16   :  { %2078 = vmatmul.mubr.msk.f32.gmra.mrb[2].mxu1 %vm57_vm0, %v382_v24  ;;  %v387_v33 = vld [vmem:[%s3145_s1 + $0x40] sm:$0xff]  ;;  %v34_v34 = vld [vmem:[%s3144_s0 + $0x68] sm:$0xff]  ;;  %v35_v35 = vld [vmem:[%s3144_s0 + $0x70] sm:$0xff]  ;;  %v620_v7 = vsub.s32 0, %v606_v0 }
  0x17   :  { %2080 = vmatprep.mubr.msk.f32.mxu1 %vm57_vm0, %v383_v25  ;;  %v388_v36 = vld [vmem:[%s3145_s1 + $0x48] sm:$0xff]  ;;  %v389_v37 = vld [vmem:[%s3145_s1 + $0x50] sm:$0xff]  ;;  %v36_v38 = vld [vmem:[%s3144_s0 + $0x78] sm:$0xff]  ;;  %v607_v1 = vsub.s32 %v604_v63, %v606_v0 }
  0x18   :  { %2028 = vmatmul.mubr.msk.f32.gmra.mrb[6].mxu0 %vm57_vm0, %v28_v22  ;;  %v37_v39 = vld [vmem:[%s3144_s0 + $0x80] sm:$0xff]  ;;  %v390_v40 = vld [vmem:[%s3145_s1 + $0x58] sm:$0xff]  ;;  %v38_v42 = vld [vmem:[%s3144_s0 + $0x88] sm:$0xff] }
  0x19   :  { %2030 = vmatprep.mubr.msk.f32.mxu0 %vm57_vm0, %v29_v23  ;;  %v391_v41 = vld [vmem:[%s3145_s1 + $0x60] sm:$0xff]  ;;  %v39_v43 = vld [vmem:[%s3144_s0 + $0x90] sm:$0xff]  ;;  %v392_v44 = vld [vmem:[%s3145_s1 + $0x68] sm:$0xff] }
  0x1a   :  { %2081 = vmatmul.mubr.msk.f32.gmra.mrb[4].mxu1 %vm57_vm0, %v384_v28  ;;  %v393_v45 = vld [vmem:[%s3145_s1 + $0x70] sm:$0xff]  ;;  %v40_v46 = vld [vmem:[%s3144_s0 + $0x98] sm:$0xff]  ;;  %v41_v47 = vld [vmem:[%s3144_s0 + $0xa0] sm:$0xff] }
  0x1b   :  { %2083 = vmatprep.mubr.msk.f32.mxu1 %vm57_vm0, %v385_v29  ;;  %v394_v48 = vld [vmem:[%s3145_s1 + $0x78] sm:$0xff]  ;;  %v42_v49 = vld [vmem:[%s3144_s0 + $0xa8] sm:$0xff]  ;;  %v43_v50 = vld [vmem:[%s3144_s0 + $0xb0] sm:$0xff] }
  0x1c   :  { %2031 = vmatmul.mubr.msk.f32.gmra.mrb[8].mxu0 %vm57_vm0, %v30_v26  ;;  %v44_v51 = vld [vmem:[%s3144_s0 + $0xb8] sm:$0xff]  ;;  %v45_v52 = vld [vmem:[%s3144_s0 + $0xc0] sm:$0xff]  ;;  %v46_v53 = vld [vmem:[%s3144_s0 + $0xc8] sm:$0xff] }
  0x1d   :  { %2033 = vmatprep.mubr.msk.f32.mxu0 %vm57_vm0, %v31_v27  ;;  %v47_v54 = vld [vmem:[%s3144_s0 + $0xd0] sm:$0xff]  ;;  %v48_v55 = vld [vmem:[%s3144_s0 + $0xd8] sm:$0xff]  ;;  %v49_v56 = vld [vmem:[%s3144_s0 + $0xe0] sm:$0xff] }
  0x1e   :  { %2084 = vmatmul.mubr.msk.f32.gmra.mrb[6].mxu1 %vm57_vm0, %v386_v32  ;;  %v50_v57 = vld [vmem:[%s3144_s0 + $0xe8] sm:$0xff]  ;;  %v51_v58 = vld [vmem:[%s3144_s0 + $0xf0] sm:$0xff]  ;;  %v52_v59 = vld [vmem:[%s3144_s0 + $0xf8] sm:$0xff]  ;;  %s2399_s0 = smov [#allocation2]  }
  0x1f   :  { %2086 = vmatprep.mubr.msk.f32.mxu1 %vm57_vm0, %v387_v33  ;;  %v1761_v2 = vld.sshfl [vmem:[%s3148_s4] sm:$0x33 pattern:$0x75316420]  ;;  %vm2659_vm1 = vmpackc.low %vm57_vm0, %vm57_vm0  ;;  %s1702_s4 = sshll.u32 %s2399_s0, 4  ;;  %s1703_s4 = int_to_ptr.vmem [resolvable:$true] %s1702_s4 }
  0x20   :  { %2034 = vmatmul.mubr.msk.f32.gmra.mrb[10].mxu0 %vm57_vm0, %v32_v30  ;;  %v601_v3 = vcombine.high %v1761_v2, %v1761_v2  ;;  %v608_v4 = vrot.slane %v1761_v2, %v607_v1  ;;  %s2374_s23 = scalar_lea.vmem %s1703_s4, 2048  ;;  %p2379_p1 = scmp.lt.s32.totalorder %s1703_s4, %s1703_s4 }
  0x21   :  { %2036 = vmatprep.mubr.msk.f32.mxu0 %vm57_vm0, %v33_v31  ;;  %p2375_p0 = scmp.ne.s32.totalorder %s1703_s4, %s2374_s23  ;;  %p2380_p2 = scmp.lt.s32.totalorder %s2374_s23, %s2374_s23 }
  0x22   :  { %2087 = vmatmul.mubr.msk.f32.gmra.mrb[8].mxu1 %vm57_vm0, %v388_v36  ;;  %v615_v5 = vrot.slane %v601_v3, %v607_v1  ;;  %v616_v6 = vcombine.high %v608_v4, %v608_v4  ;;  %v2667_v19 = vrot.slane %v608_v4, %v620_v7 }
  0x23   :  { %2089 = vmatprep.mubr.msk.f32.mxu1 %vm57_vm0, %v389_v37  ;;  %p2381_p3 = por %p2380_p2, %p2379_p1 }
  0x24   :  { %2037 = vmatmul.mubr.msk.f32.gmra.mrb[12].mxu0 %vm57_vm0, %v34_v34  ;;  %v617_v8 = vcombine.high %v615_v5, %v615_v5  ;;  %v2651_v9 = vrot.slane %v615_v5, %v620_v7  ;;  %v2653_v10 = vrot.slane %v616_v6, %v620_v7 }
  0x25   :  { %2039 = vmatprep.mubr.msk.f32.mxu0 %vm57_vm0, %v35_v35  ;;  %p2382_p4 = pnand %p2381_p3, %p2375_p0 }
  0x26   :  { %2090 = vmatmul.mubr.msk.f32.gmra.mrb[10].mxu1 %vm57_vm0, %v390_v40  ;;  %v2655_v11 = vrot.slane %v617_v8, %v620_v7 }
  0x27   :  { %2092 = vmatprep.mubr.msk.f32.mxu1 %vm57_vm0, %v391_v41 }
  0x28   :  { %2040 = vmatmul.mubr.msk.f32.gmra.mrb[14].mxu0 %vm57_vm0, %v36_v38 }
  0x29   :  { %2042 = vmatprep.mubr.msk.f32.mxu0 %vm57_vm0, %v37_v39 }
  0x2a   :  { %2093 = vmatmul.mubr.msk.f32.gmra.mrb[12].mxu1 %vm57_vm0, %v392_v44 }
  0x2b   :  { %2095 = vmatprep.mubr.msk.f32.mxu1 %vm57_vm0, %v393_v45 }
  0x2c   :  { %2043 = vmatmul.mubr.msk.f32.gmra.mrb[16].mxu0 %vm57_vm0, %v38_v42 }
  0x2d   :  { %2045 = vmatprep.mubr.msk.f32.mxu0 %vm57_vm0, %v39_v43 }
  0x2e   :  { %2096 = vmatmul.mubr.msk.f32.gmra.mrb[14].mxu1 %vm57_vm0, %v394_v48 }
  0x30   :  { %2046 = vmatmul.mubr.msk.f32.gmra.mrb[18].mxu0 %vm57_vm0, %v40_v46 }
  0x31   :  { %2048 = vmatprep.mubr.msk.f32.mxu0 %vm57_vm0, %v41_v47 }
  0x34   :  { %2049 = vmatmul.mubr.msk.f32.gmra.mrb[20].mxu0 %vm57_vm0, %v42_v49 }
  0x35   :  { %2051 = vmatprep.mubr.msk.f32.mxu0 %vm57_vm0, %v43_v50 }
  0x38   :  { %2052 = vmatmul.mubr.msk.f32.gmra.mrb[22].mxu0 %vm57_vm0, %v44_v51 }
  0x39   :  { %2054 = vmatprep.mubr.msk.f32.mxu0 %vm57_vm0, %v45_v52 }
  0x3c   :  { %2055 = vmatmul.mubr.msk.f32.gmra.mrb[24].mxu0 %vm57_vm0, %v46_v53 }
  0x3d   :  { %2057 = vmatprep.mubr.msk.f32.mxu0 %vm57_vm0, %v47_v54 }
  0x40   :  { %2058 = vmatmul.mubr.msk.f32.gmra.mrb[26].mxu0 %vm57_vm0, %v48_v55 }
  0x41   :  { %2060 = vmatprep.mubr.msk.f32.mxu0 %vm57_vm0, %v49_v56 }
  0x44   :  { %2061 = vmatmul.mubr.msk.f32.gmra.mrb[28].mxu0 %vm57_vm0, %v50_v57 }
  0x45   :  { %2063 = vmatprep.mubr.msk.f32.mxu0 %vm57_vm0, %v51_v58 }
  0x48   :  { %2064 = vmatmul.mubr.msk.f32.gmra.mrb[30].mxu0 %vm57_vm0, %v52_v59 }
  0xdf   :  { %v2020_v12 = vpop.f32.mrb[0].mxu0 }
  0xe0   :  { %v220_v13 = vpop.f32.mrb[1].mxu0 }
  0xe1   :  { %v2274_v15 = vpack.c.bf16 %v2020_v12, %v220_v13 }
  0xe3   :  { %v2023_v16 = vpop.f32.mrb[2].mxu0  ;;  %2276 = vmatprep.subr.msk.bf16.mxu0 %vm2659_vm1, %v2274_v15 }
  0xe4   :  { %v230_v17 = vpop.f32.mrb[3].mxu0  ;;  %2279 = vmatpush3.bf16.xpose.msk.msra.mxu0 %vm2659_vm1, %v2274_v15 }
  0xe5   :  { %v2280_v18 = vpack.c.bf16 %v2023_v16, %v230_v17  ;;  %v2671_v22 = vpop.f32.mrb[0].mxu1 }
  0xe6   :  { %v2675_v24 = vmul.f32 %v2671_v22, %v2651_v9  ;;  %v2679_v25 = vmul.f32 %v2671_v22, %v2653_v10  ;;  %v513_v26 = vpop.f32.mrb[1].mxu1  ;;  %v2683_v27 = vmul.f32 %v2671_v22, %v2655_v11 }
  0xe7   :  { %v2026_v20 = vpop.f32.mrb[4].mxu0  ;;  %2282 = vmatprep.subr.msk.bf16.mxu0 %vm2659_vm1, %v2280_v18  ;;  %v638_v28 = vmul.f32 %v2667_v19, %v513_v26  ;;  %v2687_v29 = vmul.f32 %v2651_v9, %v513_v26  ;;  %v2690_v30 = vmul.f32 %v2653_v10, %v513_v26  ;;  %v2693_v32 = vmul.f32 %v2655_v11, %v513_v26 }
  0xe8   :  { %v240_v21 = vpop.f32.mrb[5].mxu0 }
  0xe9   :  { %v2286_v23 = vpack.c.bf16 %v2026_v20, %v240_v21  ;;  %v2697_v34 = vpop.f32.mrb[2].mxu1  ;;  %2130 = vmatprep.mubr.msk.f32.mxu0 %vm57_vm0, %v638_v28 }
  0xea   :  { %v2704_v36 = vmul.f32 %v2697_v34, %v2651_v9  ;;  %v2708_v37 = vmul.f32 %v2697_v34, %v2653_v10  ;;  %v2710_v38 = vpop.f32.mrb[3].mxu1  ;;  %v2714_v39 = vmul.f32 %v2697_v34, %v2655_v11 }
  0xeb   :  { %v2029_v31 = vpop.f32.mrb[6].mxu0  ;;  %v2718_v40 = vmul.f32 %v2651_v9, %v2710_v38  ;;  %v2722_v41 = vmul.f32 %v2653_v10, %v2710_v38  ;;  %v2726_v43 = vmul.f32 %v2655_v11, %v2710_v38 }
  0xec   :  { %v250_v33 = vpop.f32.mrb[7].mxu0  ;;  %2285 = vmatpush3.bf16.xpose.msk.msra.mxu0 %vm2659_vm1, %v2280_v18 }
  0xed   :  { %v2292_v35 = vpack.c.bf16 %v2029_v31, %v250_v33  ;;  %2288 = vmatprep.subr.msk.bf16.mxu0 %vm2659_vm1, %v2286_v23  ;;  %v2082_v45 = vpop.f32.mrb[4].mxu1 }
  0xee   :  { %v2731_v47 = vmul.f32 %v2082_v45, %v2667_v19  ;;  %v2734_v48 = vmul.f32 %v2082_v45, %v2651_v9  ;;  %v2737_v49 = vmul.f32 %v2082_v45, %v2653_v10  ;;  %v2739_v50 = vpop.f32.mrb[5].mxu1  ;;  %v2742_v51 = vmul.f32 %v2082_v45, %v2655_v11 }
  0xef   :  { %v2032_v42 = vpop.f32.mrb[8].mxu0  ;;  %v2746_v52 = vmul.f32 %v2651_v9, %v2739_v50  ;;  %v2750_v53 = vmul.f32 %v2653_v10, %v2739_v50  ;;  %v2754_v55 = vmul.f32 %v2655_v11, %v2739_v50 }
  0xf0   :  { %v260_v44 = vpop.f32.mrb[9].mxu0 }
  0xf1   :  { %v2728_v46 = vpack.c.bf16 %v2032_v42, %v260_v44  ;;  %v2085_v57 = vpop.f32.mrb[6].mxu1 }
  0xf2   :  { %v2763_v59 = vmul.f32 %v2085_v57, %v2667_v19  ;;  %v2766_v60 = vmul.f32 %v2085_v57, %v2651_v9  ;;  %v2769_v61 = vmul.f32 %v2085_v57, %v2653_v10  ;;  %v543_v62 = vpop.f32.mrb[7].mxu1  ;;  %v2772_v63 = vmul.f32 %v2085_v57, %v2655_v11 }
  0xf3   :  { %v2035_v54 = vpop.f32.mrb[10].mxu0  ;;  %v2775_v0 = vmul.f32 %v2667_v19, %v543_v62  ;;  %v2778_v1 = vmul.f32 %v2651_v9, %v543_v62  ;;  %v2781_v2 = vmul.f32 %v2653_v10, %v543_v62  ;;  %v2784_v4 = vmul.f32 %v2655_v11, %v543_v62 }
  0xf4   :  { %v270_v56 = vpop.f32.mrb[11].mxu0  ;;  %2291 = vmatpush3.bf16.xpose.msk.msra.mxu0 %vm2659_vm1, %v2286_v23 }
  0xf5   :  { %v2758_v58 = vpack.c.bf16 %v2035_v54, %v270_v56  ;;  %2294 = vmatprep.subr.msk.bf16.mxu0 %vm2659_vm1, %v2292_v35  ;;  %v2088_v6 = vpop.f32.mrb[8].mxu1 }
  0xf6   :  { %v2789_v8 = vmul.f32 %v2088_v6, %v2667_v19  ;;  %v2792_v12 = vmul.f32 %v2088_v6, %v2651_v9  ;;  %v2795_v13 = vmul.f32 %v2088_v6, %v2653_v10  ;;  %v553_v15 = vpop.f32.mrb[9].mxu1  ;;  %v2798_v16 = vmul.f32 %v2088_v6, %v2655_v11 }
  0xf7   :  { %v2038_v3 = vpop.f32.mrb[12].mxu0  ;;  %v1167_v17 = vmul.f32 %v2667_v19, %v553_v15  ;;  %v2802_v18 = vmul.f32 %v2651_v9, %v553_v15  ;;  %v2805_v20 = vmul.f32 %v2653_v10, %v553_v15  ;;  %v2808_v23 = vmul.f32 %v2655_v11, %v553_v15 }
  0xf8   :  { %v280_v5 = vpop.f32.mrb[13].mxu0  ;;  %3152 = vst [vmem:[#allocation5_spill] sm:$0xff] %v2795_v13  ;;  %3153 = vst [vmem:[#allocation6_spill] sm:$0xff] %v2798_v16 }
  0xf9   :  { %v2786_v7 = vpack.c.bf16 %v2038_v3, %v280_v5  ;;  %3154 = vst [vmem:[#allocation7_spill] sm:$0xff] %v2808_v23  ;;  %v2091_v28 = vpop.f32.mrb[10].mxu1  ;;  %2210 = vmatprep.mubr.msk.f32.mxu1 %vm57_vm0, %v1167_v17 }
  0xfa   :  { %v2819_v33 = vmul.f32 %v2091_v28, %v2667_v19  ;;  %v2822_v42 = vmul.f32 %v2091_v28, %v2651_v9  ;;  %v2825_v44 = vmul.f32 %v2091_v28, %v2653_v10  ;;  %v563_v45 = vpop.f32.mrb[11].mxu1 }
  0xfb   :  { %v2041_v21 = vpop.f32.mrb[14].mxu0  ;;  %v2831_v54 = vmul.f32 %v2667_v19, %v563_v45  ;;  %v2834_v56 = vmul.f32 %v2651_v9, %v563_v45  ;;  %v2837_v57 = vmul.f32 %v2653_v10, %v563_v45  ;;  %v2840_v3 = vmul.f32 %v2655_v11, %v563_v45 }
  0xfc   :  { %v290_v26 = vpop.f32.mrb[15].mxu0  ;;  %2297 = vmatpush3.bf16.xpose.msk.msra.mxu0 %vm2659_vm1, %v2292_v35  ;;  %3155 = vst [vmem:[#allocation8_spill] sm:$0xff] %v2825_v44  ;;  %v2828_v35 = vmul.f32 %v2091_v28, %v2655_v11 }
  0xfd   :  { %v2813_v31 = vpack.c.bf16 %v2041_v21, %v290_v26  ;;  %2300 = vmatprep.subr.msk.bf16.mxu0 %vm2659_vm1, %v2728_v46  ;;  %3157 = vst [vmem:[#allocation10_spill] sm:$0xff] %v2837_v57  ;;  %3158 = vst [vmem:[#allocation11_spill] sm:$0xff] %v2840_v3  ;;  %v2094_v6 = vpop.f32.mrb[12].mxu1 }
  0xfe   :  { %3156 = vst [vmem:[#allocation9_spill] sm:$0xff] %v2828_v35  ;;  %v2843_v17 = vmul.f32 %v2094_v6, %v2667_v19  ;;  %v2846_v21 = vmul.f32 %v2094_v6, %v2651_v9  ;;  %v2849_v26 = vmul.f32 %v2094_v6, %v2653_v10  ;;  %v573_v28 = vpop.f32.mrb[13].mxu1  ;;  %v2852_v35 = vmul.f32 %v2094_v6, %v2655_v11 }
  0xff   :  { %v2044_v62 = vpop.f32.mrb[16].mxu0  ;;  %v2855_v16 = vmul.f32 %v2667_v19, %v573_v28  ;;  %v2858_v45 = vmul.f32 %v2651_v9, %v573_v28  ;;  %v2866_v3 = vmul.f32 %v2655_v11, %v573_v28  ;;  %v3165_v14 = vld [vmem:[#allocation5_spill] sm:$0xff] }
 0x100   :  { %v300_v5 = vpop.f32.mrb[17].mxu0  ;;  %3159 = vst [vmem:[#allocation12_spill] sm:$0xff] %v2849_v26  ;;  %3160 = vst [vmem:[#allocation13_spill] sm:$0xff] %v2852_v35 }
 0x101   :  { %v2322_v15 = vpack.c.bf16 %v2044_v62, %v300_v5  ;;  %v2861_v62 = vmul.f32 %v2653_v10, %v573_v28  ;;  %3162 = vst [vmem:[#allocation15_spill] sm:$0xff] %v2866_v3  ;;  %v2097_v35 = vpop.f32.mrb[14].mxu1 }
 0x102   :  { %v2877_v26 = vmul.f32 %v2097_v35, %v2667_v19  ;;  %v2880_v28 = vmul.f32 %v2097_v35, %v2651_v9  ;;  %v2883_v3 = vmul.f32 %v2097_v35, %v2653_v10 }
 0x103   :  { %3161 = vst [vmem:[#allocation14_spill] sm:$0xff] %v2861_v62  ;;  %2324 = vmatprep.subr.msk.bf16.mxu1 %vm2659_vm1, %v2322_v15  ;;  %v2047_v5 = vpop.f32.mrb[18].mxu0  ;;  %v2886_v62 = vmul.f32 %v2097_v35, %v2655_v11 }
 0x104   :  { %2303 = vmatpush3.bf16.xpose.msk.msra.mxu0 %vm2659_vm1, %v2728_v46  ;;  %2327 = vmatpush3.bf16.xpose.msk.msra.mxu1 %vm2659_vm1, %v2322_v15  ;;  %v310_v6 = vpop.f32.mrb[19].mxu0  ;;  %3163 = vst [vmem:[#allocation16_spill] sm:$0xff] %v2883_v3  ;;  %v583_v46 = vpop.f32.mrb[15].mxu1 }
 0x105   :  { %2306 = vmatprep.subr.msk.bf16.mxu0 %vm2659_vm1, %v2758_v58  ;;  %v2328_v23 = vpack.c.bf16 %v2047_v5, %v310_v6  ;;  %3164 = vst [vmem:[#allocation17_spill] sm:$0xff] %v2886_v62  ;;  %v2889_v15 = vmul.f32 %v2667_v19, %v583_v46  ;;  %v2892_v44 = vmul.f32 %v2651_v9, %v583_v46 }
 0x106   :  { %v2895_v5 = vmul.f32 %v2653_v10, %v583_v46  ;;  %v2900_v57 = vmul.f32 %v2655_v11, %v583_v46  ;;  %v639_v62 = vmul.f32 %v2671_v22, %v2667_v19  ;;  %v3167_v22 = vld [vmem:[#allocation8_spill] sm:$0xff] }
 0x107   :  { %2330 = vmatprep.subr.msk.bf16.mxu1 %vm2659_vm1, %v2328_v23  ;;  %v2050_v6 = vpop.f32.mrb[20].mxu0 }
 0x108   :  { %v320_v3 = vpop.f32.mrb[21].mxu0 }
 0x109   :  { %v2334_v13 = vpack.c.bf16 %v2050_v6, %v320_v3 }
 0x10b   :  { %v2053_v35 = vpop.f32.mrb[22].mxu0 }
 0x10c   :  { %2309 = vmatpush3.bf16.xpose.msk.msra.mxu0 %vm2659_vm1, %v2758_v58  ;;  %2333 = vmatpush3.bf16.xpose.msk.msra.mxu1 %vm2659_vm1, %v2328_v23  ;;  %v330_v9 = vpop.f32.mrb[23].mxu0 }
 0x10d   :  { %2312 = vmatprep.subr.msk.bf16.mxu0 %vm2659_vm1, %v2786_v7  ;;  %2336 = vmatprep.subr.msk.bf16.mxu1 %vm2659_vm1, %v2334_v13  ;;  %v2340_v10 = vpack.c.bf16 %v2053_v35, %v330_v9 }
 0x10f   :  { %v2056_v11 = vpop.f32.mrb[24].mxu0 }
 0x110   :  { %v340_v46 = vpop.f32.mrb[25].mxu0 }
 0x111   :  { %v2346_v3 = vpack.c.bf16 %v2056_v11, %v340_v46 }
 0x113   :  { %v2059_v6 = vpop.f32.mrb[26].mxu0 }
 0x114   :  { %2315 = vmatpush3.bf16.xpose.msk.msra.mxu0 %vm2659_vm1, %v2786_v7  ;;  %2339 = vmatpush3.bf16.xpose.msk.msra.mxu1 %vm2659_vm1, %v2334_v13  ;;  %v350_v58 = vpop.f32.mrb[27].mxu0 }
 0x115   :  { %2318 = vmatprep.subr.msk.bf16.mxu0 %vm2659_vm1, %v2813_v31  ;;  %2342 = vmatprep.subr.msk.bf16.mxu1 %vm2659_vm1, %v2340_v10  ;;  %v2352_v23 = vpack.c.bf16 %v2059_v6, %v350_v58  ;;  %v640_v6 = vmul.f32 %v2667_v19, %v2710_v38  ;;  %v641_v58 = vmul.f32 %v2697_v34, %v2667_v19  ;;  %v3174_v34 = vld [vmem:[#allocation9_spill] sm:$0xff] }
 0x116   :  { %v3177_v38 = vld [vmem:[#allocation17_spill] sm:$0xff] }
 0x117   :  { %v2062_v35 = vpop.f32.mrb[28].mxu0 }
 0x118   :  { %v360_v9 = vpop.f32.mrb[29].mxu0 }
 0x119   :  { %v2358_v11 = vpack.c.bf16 %v2062_v35, %v360_v9 }
 0x11b   :  { %v2065_v46 = vpop.f32.mrb[30].mxu0 }
 0x11c   :  { %2321 = vmatpush3.bf16.xpose.msk.msra.mxu0 %vm2659_vm1, %v2813_v31  ;;  %2345 = vmatpush3.bf16.xpose.msk.msra.mxu1 %vm2659_vm1, %v2340_v10  ;;  %v370_v7 = vpop.f32.mrb[31].mxu0  ;;  %v642_v31 = vmul.f32 %v2667_v19, %v2739_v50  ;;  %v3166_v19 = vld [vmem:[#allocation10_spill] sm:$0xff] }
 0x11d   :  { %2348 = vmatprep.subr.msk.bf16.mxu1 %vm2659_vm1, %v2346_v3  ;;  %v2364_v13 = vpack.c.bf16 %v2065_v46, %v370_v7 }
 0x123   :  { %2131 = vmatmul.mubr.msk.f32.vlgmr.msra.gmra.mrb[32].mxu0 %vm57_vm0, %v639_v62 }
 0x124   :  { %2351 = vmatpush3.bf16.xpose.msk.msra.mxu1 %vm2659_vm1, %v2346_v3  ;;  %2133 = vmatprep.mubr.msk.f32.mxu0 %vm57_vm0, %v640_v6 }
 0x125   :  { %2354 = vmatprep.subr.msk.bf16.mxu1 %vm2659_vm1, %v2352_v23 }
 0x127   :  { %2134 = vmatmul.mubr.msk.f32.gmra.mrb[34].mxu0 %vm57_vm0, %v641_v58 }
 0x128   :  { %2136 = vmatprep.mubr.msk.f32.mxu0 %vm57_vm0, %v642_v31 }
 0x12b   :  { %2137 = vmatmul.mubr.msk.f32.gmra.mrb[36].mxu0 %vm57_vm0, %v2731_v47 }
 0x12c   :  { %2357 = vmatpush3.bf16.xpose.msk.msra.mxu1 %vm2659_vm1, %v2352_v23  ;;  %2139 = vmatprep.mubr.msk.f32.mxu0 %vm57_vm0, %v2775_v0 }
 0x12d   :  { %2360 = vmatprep.subr.msk.bf16.mxu1 %vm2659_vm1, %v2358_v11 }
 0x12f   :  { %2140 = vmatmul.mubr.msk.f32.gmra.mrb[38].mxu0 %vm57_vm0, %v2763_v59 }
 0x130   :  { %2142 = vmatprep.mubr.msk.f32.mxu0 %vm57_vm0, %v2687_v29  ;;  %v3171_v29 = vld [vmem:[#allocation7_spill] sm:$0xff] }
 0x133   :  { %2143 = vmatmul.mubr.msk.f32.gmra.mrb[40].mxu0 %vm57_vm0, %v2675_v24  ;;  %v3168_v24 = vld [vmem:[#allocation14_spill] sm:$0xff] }
 0x134   :  { %2363 = vmatpush3.bf16.xpose.msk.msra.mxu1 %vm2659_vm1, %v2358_v11  ;;  %2145 = vmatprep.mubr.msk.f32.mxu0 %vm57_vm0, %v2718_v40 }
 0x135   :  { %2366 = vmatprep.subr.msk.bf16.mxu1 %vm2659_vm1, %v2364_v13 }
 0x137   :  { %2146 = vmatmul.mubr.msk.f32.gmra.mrb[42].mxu0 %vm57_vm0, %v2704_v36  ;;  %v3175_v36 = vld [vmem:[#allocation15_spill] sm:$0xff] }
 0x138   :  { %2148 = vmatprep.mubr.msk.f32.mxu0 %vm57_vm0, %v2746_v52 }
 0x13b   :  { %2149 = vmatmul.mubr.msk.f32.gmra.mrb[44].mxu0 %vm57_vm0, %v2734_v48 }
 0x13c   :  { %2369 = vmatpush3.bf16.xpose.msk.msra.mxu1 %vm2659_vm1, %v2364_v13  ;;  %2151 = vmatprep.mubr.msk.f32.mxu0 %vm57_vm0, %v2778_v1 }
 0x13f   :  { %2152 = vmatmul.mubr.msk.f32.gmra.mrb[46].mxu0 %vm57_vm0, %v2766_v60 }
 0x140   :  { %2154 = vmatprep.mubr.msk.f32.mxu0 %vm57_vm0, %v2690_v30  ;;  %v3172_v30 = vld [vmem:[#allocation6_spill] sm:$0xff] }
 0x143   :  { %2155 = vmatmul.mubr.msk.f32.gmra.mrb[48].mxu0 %vm57_vm0, %v2679_v25  ;;  %2211 = vmatmul.mubr.msk.f32.vlgmr.msra.gmra.mrb[16].mxu1 %vm57_vm0, %v2789_v8  ;;  %v3169_v25 = vld [vmem:[#allocation12_spill] sm:$0xff] }
 0x144   :  { %2157 = vmatprep.mubr.msk.f32.mxu0 %vm57_vm0, %v2722_v41  ;;  %2213 = vmatprep.mubr.msk.f32.mxu1 %vm57_vm0, %v2831_v54 }
 0x147   :  { %2158 = vmatmul.mubr.msk.f32.gmra.mrb[50].mxu0 %vm57_vm0, %v2708_v37  ;;  %2214 = vmatmul.mubr.msk.f32.gmra.mrb[18].mxu1 %vm57_vm0, %v2819_v33  ;;  %v3176_v37 = vld [vmem:[#allocation13_spill] sm:$0xff] }
 0x148   :  { %2160 = vmatprep.mubr.msk.f32.mxu0 %vm57_vm0, %v2750_v53  ;;  %2216 = vmatprep.mubr.msk.f32.mxu1 %vm57_vm0, %v2855_v16 }
 0x14b   :  { %2161 = vmatmul.mubr.msk.f32.gmra.mrb[52].mxu0 %vm57_vm0, %v2737_v49  ;;  %2217 = vmatmul.mubr.msk.f32.gmra.mrb[20].mxu1 %vm57_vm0, %v2843_v17 }
 0x14c   :  { %2163 = vmatprep.mubr.msk.f32.mxu0 %vm57_vm0, %v2781_v2  ;;  %2219 = vmatprep.mubr.msk.f32.mxu1 %vm57_vm0, %v2889_v15 }
 0x14f   :  { %2164 = vmatmul.mubr.msk.f32.gmra.mrb[54].mxu0 %vm57_vm0, %v2769_v61  ;;  %2220 = vmatmul.mubr.msk.f32.gmra.mrb[22].mxu1 %vm57_vm0, %v2877_v26 }
 0x150   :  { %2166 = vmatprep.mubr.msk.f32.mxu0 %vm57_vm0, %v2693_v32  ;;  %2222 = vmatprep.mubr.msk.f32.mxu1 %vm57_vm0, %v2802_v18  ;;  %v3173_v32 = vld [vmem:[#allocation11_spill] sm:$0xff] }
 0x153   :  { %2167 = vmatmul.mubr.msk.f32.gmra.mrb[56].mxu0 %vm57_vm0, %v2683_v27  ;;  %2223 = vmatmul.mubr.msk.f32.gmra.mrb[24].mxu1 %vm57_vm0, %v2792_v12  ;;  %v3170_v27 = vld [vmem:[#allocation16_spill] sm:$0xff] }
 0x154   :  { %2169 = vmatprep.mubr.msk.f32.mxu0 %vm57_vm0, %v2726_v43  ;;  %2225 = vmatprep.mubr.msk.f32.mxu1 %vm57_vm0, %v2834_v56 }
 0x157   :  { %2170 = vmatmul.mubr.msk.f32.gmra.mrb[58].mxu0 %vm57_vm0, %v2714_v39  ;;  %2226 = vmatmul.mubr.msk.f32.gmra.mrb[26].mxu1 %vm57_vm0, %v2822_v42 }
 0x158   :  { %2172 = vmatprep.mubr.msk.f32.mxu0 %vm57_vm0, %v2754_v55  ;;  %2228 = vmatprep.mubr.msk.f32.mxu1 %vm57_vm0, %v2858_v45 }
 0x15b   :  { %2173 = vmatmul.mubr.msk.f32.gmra.mrb[60].mxu0 %vm57_vm0, %v2742_v51  ;;  %2229 = vmatmul.mubr.msk.f32.gmra.mrb[28].mxu1 %vm57_vm0, %v2846_v21 }
 0x15c   :  { %2175 = vmatprep.mubr.msk.f32.mxu0 %vm57_vm0, %v2784_v4  ;;  %2231 = vmatprep.mubr.msk.f32.mxu1 %vm57_vm0, %v2892_v44 }
 0x15f   :  { %2176 = vmatmul.mubr.msk.f32.gmra.mrb[62].mxu0 %vm57_vm0, %v2772_v63  ;;  %2232 = vmatmul.mubr.msk.f32.gmra.mrb[30].mxu1 %vm57_vm0, %v2880_v28 }
 0x160   :  { %2234 = vmatprep.mubr.msk.f32.mxu1 %vm57_vm0, %v2805_v20 }
 0x163   :  { %2235 = vmatmul.mubr.msk.f32.gmra.mrb[32].mxu1 %vm57_vm0, %v3165_v14 }
 0x164   :  { %2237 = vmatprep.mubr.msk.f32.mxu1 %vm57_vm0, %v3166_v19 }
 0x167   :  { %2238 = vmatmul.mubr.msk.f32.gmra.mrb[34].mxu1 %vm57_vm0, %v3167_v22 }
 0x168   :  { %2240 = vmatprep.mubr.msk.f32.mxu1 %vm57_vm0, %v3168_v24 }
 0x16b   :  { %2241 = vmatmul.mubr.msk.f32.gmra.mrb[36].mxu1 %vm57_vm0, %v3169_v25 }
 0x16c   :  { %2243 = vmatprep.mubr.msk.f32.mxu1 %vm57_vm0, %v2895_v5 }
 0x16f   :  { %2244 = vmatmul.mubr.msk.f32.gmra.mrb[38].mxu1 %vm57_vm0, %v3170_v27 }
 0x170   :  { %2246 = vmatprep.mubr.msk.f32.mxu1 %vm57_vm0, %v3171_v29 }
 0x173   :  { %2247 = vmatmul.mubr.msk.f32.gmra.mrb[40].mxu1 %vm57_vm0, %v3172_v30 }
 0x174   :  { %2249 = vmatprep.mubr.msk.f32.mxu1 %vm57_vm0, %v3173_v32 }
 0x177   :  { %2250 = vmatmul.mubr.msk.f32.gmra.mrb[42].mxu1 %vm57_vm0, %v3174_v34 }
 0x178   :  { %2252 = vmatprep.mubr.msk.f32.mxu1 %vm57_vm0, %v3175_v36 }
 0x17b   :  { %2253 = vmatmul.mubr.msk.f32.gmra.mrb[44].mxu1 %vm57_vm0, %v3176_v37 }
 0x17c   :  { %2255 = vmatprep.mubr.msk.f32.mxu1 %vm57_vm0, %v2900_v57 }
 0x17f   :  { %2256 = vmatmul.mubr.msk.f32.gmra.mrb[46].mxu1 %vm57_vm0, %v3177_v38 }
 0x1f6   :  { %v2132_v39 = vpop.f32.mrb[32].mxu0 }
 0x1f7   :  { %v880_v40 = vpop.f32.mrb[33].mxu0  ;;  %v1072_v51 = vmul.f32 0.2, %v2132_v39  ;;  %vm1040_vm2 = vcmp.ge.f32.partialorder %v2132_v39, 0.0 }
 0x1f8   :  { %v1071_v52 = vmul.f32 0.2, %v880_v40  ;;  %vm1039_vm3 = vcmp.ge.f32.partialorder %v880_v40, 0.0 }
 0x1f9   :  { %v1104_v63 = vsel %vm1040_vm2, %v2132_v39, %v1072_v51 }
 0x1fa   :  { %v2135_v41 = vpop.f32.mrb[34].mxu0  ;;  %v1103_v2 = vsel %vm1039_vm3, %v880_v40, %v1071_v52 }
 0x1fb   :  { %v890_v43 = vpop.f32.mrb[35].mxu0  ;;  %v1074_v60 = vmul.f32 0.2, %v2135_v41  ;;  %vm1042_vm6 = vcmp.ge.f32.partialorder %v2135_v41, 0.0 }
 0x1fc   :  { %v1073_v0 = vmul.f32 0.2, %v890_v43  ;;  %vm1041_vm7 = vcmp.ge.f32.partialorder %v890_v43, 0.0 }
 0x1fd   :  { %v1106_v33 = vsel %vm1042_vm6, %v2135_v41, %v1074_v60 }
 0x1fe   :  { %v2138_v47 = vpop.f32.mrb[36].mxu0  ;;  %v1105_v44 = vsel %vm1041_vm7, %v890_v43, %v1073_v0 }
 0x1ff   :  { %v900_v48 = vpop.f32.mrb[37].mxu0  ;;  %v1076_v54 = vmul.f32 0.2, %v2138_v47  ;;  %vm1044_vm10 = vcmp.ge.f32.partialorder %v2138_v47, 0.0 }
 0x200   :  { %v1075_v56 = vmul.f32 0.2, %v900_v48  ;;  %vm1043_vm11 = vcmp.ge.f32.partialorder %v900_v48, 0.0 }
 0x201   :  { %v1108_v5 = vsel %vm1044_vm10, %v2138_v47, %v1076_v54 }
 0x202   :  { %v2141_v49 = vpop.f32.mrb[38].mxu0  ;;  %v1107_v10 = vsel %vm1043_vm11, %v900_v48, %v1075_v56 }
 0x203   :  { %v910_v50 = vpop.f32.mrb[39].mxu0  ;;  %v1078_v3 = vmul.f32 0.2, %v2141_v49  ;;  %vm1046_vm14 = vcmp.ge.f32.partialorder %v2141_v49, 0.0 }
 0x204   :  { %v1077_v35 = vmul.f32 0.2, %v910_v50  ;;  %vm1045_vm15 = vcmp.ge.f32.partialorder %v910_v50, 0.0 }
 0x205   :  { %v1110_v31 = vsel %vm1046_vm14, %v2141_v49, %v1078_v3 }
 0x206   :  { %v2144_v53 = vpop.f32.mrb[40].mxu0  ;;  %v1109_v19 = vsel %vm1045_vm15, %v910_v50, %v1077_v35 }
 0x207   :  { %vm1048_vm4 = vcmp.ge.f32.partialorder %v2144_v53, 0.0  ;;  %v1080_v55 = vmul.f32 0.2, %v2144_v53  ;;  %v920_v59 = vpop.f32.mrb[41].mxu0 }
 0x208   :  { %vm1047_vm5 = vcmp.ge.f32.partialorder %v920_v59, 0.0  ;;  %v1079_v61 = vmul.f32 0.2, %v920_v59 }
 0x209   :  { %v1112_v1 = vsel %vm1048_vm4, %v2144_v53, %v1080_v55 }
 0x20a   :  { %v1136_v4 = vadd.f32 %v1112_v1, %v1104_v63  ;;  %v1111_v8 = vsel %vm1047_vm5, %v920_v59, %v1079_v61  ;;  %v2147_v12 = vpop.f32.mrb[42].mxu0 }
 0x20b   :  { %v1135_v16 = vadd.f32 %v1111_v8, %v1103_v2  ;;  %vm1050_vm8 = vcmp.ge.f32.partialorder %v2147_v12, 0.0  ;;  %v1082_v18 = vmul.f32 0.2, %v2147_v12  ;;  %v930_v20 = vpop.f32.mrb[43].mxu0 }
 0x20c   :  { %vm1049_vm9 = vcmp.ge.f32.partialorder %v930_v20, 0.0  ;;  %v1081_v42 = vmul.f32 0.2, %v930_v20 }
 0x20d   :  { %v1114_v57 = vsel %vm1050_vm8, %v2147_v12, %v1082_v18 }
 0x20e   :  { %v1138_v17 = vadd.f32 %v1114_v57, %v1106_v33  ;;  %v1113_v21 = vsel %vm1049_vm9, %v930_v20, %v1081_v42  ;;  %v2150_v26 = vpop.f32.mrb[44].mxu0 }
 0x20f   :  { %v1137_v45 = vadd.f32 %v1113_v21, %v1105_v44  ;;  %vm1052_vm12 = vcmp.ge.f32.partialorder %v2150_v26, 0.0  ;;  %v1084_v62 = vmul.f32 0.2, %v2150_v26  ;;  %v940_v28 = vpop.f32.mrb[45].mxu0 }
 0x210   :  { %vm1051_vm13 = vcmp.ge.f32.partialorder %v940_v28, 0.0  ;;  %v1083_v15 = vmul.f32 0.2, %v940_v28 }
 0x211   :  { %v1116_v23 = vsel %vm1052_vm12, %v2150_v26, %v1084_v62 }
 0x212   :  { %v1140_v9 = vadd.f32 %v1116_v23, %v1108_v5  ;;  %v1115_v11 = vsel %vm1051_vm13, %v940_v28, %v1083_v15  ;;  %v2153_v46 = vpop.f32.mrb[46].mxu0 }
 0x213   :  { %v1139_v7 = vadd.f32 %v1115_v11, %v1107_v10  ;;  %vm1054_vm0 = vcmp.ge.f32.partialorder %v2153_v46, 0.0  ;;  %v1086_v13 = vmul.f32 0.2, %v2153_v46  ;;  %v950_v6 = vpop.f32.mrb[47].mxu0 }
 0x214   :  { %vm1053_vm1 = vcmp.ge.f32.partialorder %v950_v6, 0.0  ;;  %v1085_v58 = vmul.f32 0.2, %v950_v6 }
 0x215   :  { %v1118_v14 = vsel %vm1054_vm0, %v2153_v46, %v1086_v13 }
 0x216   :  { %v3071_v22 = vadd.f32 %v1118_v14, %v1110_v31  ;;  %v1117_v24 = vsel %vm1053_vm1, %v950_v6, %v1085_v58  ;;  %v2156_v25 = vpop.f32.mrb[48].mxu0  ;;  %v2212_v27 = vpop.f32.mrb[16].mxu1 }
 0x217   :  { %v3073_v29 = vadd.f32 %v1117_v24, %v1109_v19  ;;  %vm1056_vm2 = vcmp.ge.f32.partialorder %v2156_v25, 0.0  ;;  %v1088_v30 = vmul.f32 0.2, %v2156_v25  ;;  %v960_v32 = vpop.f32.mrb[49].mxu0  ;;  %v1409_v34 = vpop.f32.mrb[17].mxu1  ;;  %vm1569_vm6 = vcmp.ge.f32.partialorder %v2212_v27, 0.0 }
 0x218   :  { %vm1055_vm3 = vcmp.ge.f32.partialorder %v960_v32, 0.0  ;;  %v1087_v36 = vmul.f32 0.2, %v960_v32  ;;  %v1601_v52 = vmul.f32 0.2, %v2212_v27  ;;  %vm1568_vm7 = vcmp.ge.f32.partialorder %v1409_v34, 0.0 }
 0x219   :  { %v1120_v37 = vsel %vm1056_vm2, %v2156_v25, %v1088_v30  ;;  %v1600_v53 = vmul.f32 0.2, %v1409_v34 }
 0x21a   :  { %v3075_v38 = vadd.f32 %v1136_v4, %v1120_v37  ;;  %v1119_v39 = vsel %vm1055_vm3, %v960_v32, %v1087_v36  ;;  %v2159_v40 = vpop.f32.mrb[50].mxu0  ;;  %v2215_v41 = vpop.f32.mrb[18].mxu1  ;;  %v1633_v26 = vsel %vm1569_vm6, %v2212_v27, %v1601_v52 }
 0x21b   :  { %v3077_v43 = vadd.f32 %v1135_v16, %v1119_v39  ;;  %vm1058_vm4 = vcmp.ge.f32.partialorder %v2159_v40, 0.0  ;;  %v1090_v47 = vmul.f32 0.2, %v2159_v40  ;;  %v970_v48 = vpop.f32.mrb[51].mxu0  ;;  %v1419_v49 = vpop.f32.mrb[19].mxu1  ;;  %vm1571_vm9 = vcmp.ge.f32.partialorder %v2215_v41, 0.0 }
 0x21c   :  { %vm1057_vm5 = vcmp.ge.f32.partialorder %v970_v48, 0.0  ;;  %v1089_v50 = vmul.f32 0.2, %v970_v48  ;;  %v1603_v4 = vmul.f32 0.2, %v2215_v41  ;;  %vm1570_vm11 = vcmp.ge.f32.partialorder %v1419_v49, 0.0 }
 0x21d   :  { %v1122_v51 = vsel %vm1058_vm4, %v2159_v40, %v1090_v47  ;;  %v1602_v12 = vmul.f32 0.2, %v1419_v49  ;;  %v1632_v62 = vsel %vm1568_vm7, %v1409_v34, %v1600_v53 }
 0x21e   :  { %v3079_v55 = vadd.f32 %v1138_v17, %v1122_v51  ;;  %v1121_v59 = vsel %vm1057_vm5, %v970_v48, %v1089_v50  ;;  %v2162_v60 = vpop.f32.mrb[52].mxu0  ;;  %v2218_v61 = vpop.f32.mrb[20].mxu1  ;;  %v1635_v28 = vsel %vm1571_vm9, %v2215_v41, %v1603_v4 }
 0x21f   :  { %v3081_v63 = vadd.f32 %v1137_v45, %v1121_v59  ;;  %vm1060_vm8 = vcmp.ge.f32.partialorder %v2162_v60, 0.0  ;;  %v1092_v0 = vmul.f32 0.2, %v2162_v60  ;;  %v980_v1 = vpop.f32.mrb[53].mxu0  ;;  %v1429_v2 = vpop.f32.mrb[21].mxu1  ;;  %vm1573_vm12 = vcmp.ge.f32.partialorder %v2218_v61, 0.0 }
 0x220   :  { %vm1059_vm10 = vcmp.ge.f32.partialorder %v980_v1, 0.0  ;;  %v1091_v8 = vmul.f32 0.2, %v980_v1  ;;  %v1605_v20 = vmul.f32 0.2, %v2218_v61  ;;  %vm1572_vm13 = vcmp.ge.f32.partialorder %v1429_v2, 0.0 }
 0x221   :  { %v1124_v16 = vsel %vm1060_vm8, %v2162_v60, %v1092_v0  ;;  %v1604_v42 = vmul.f32 0.2, %v1429_v2  ;;  %v1634_v15 = vsel %vm1570_vm11, %v1419_v49, %v1602_v12 }
 0x222   :  { %v3083_v18 = vadd.f32 %v1140_v9, %v1124_v16  ;;  %v1123_v33 = vsel %vm1059_vm10, %v980_v1, %v1091_v8  ;;  %v2165_v44 = vpop.f32.mrb[54].mxu0  ;;  %v2221_v54 = vpop.f32.mrb[22].mxu1  ;;  %v3094_v10 = vsel %vm1573_vm12, %v2218_v61, %v1605_v20 }
 0x223   :  { %v3085_v56 = vadd.f32 %v1139_v7, %v1123_v33  ;;  %vm1062_vm14 = vcmp.ge.f32.partialorder %v2165_v44, 0.0  ;;  %v1094_v57 = vmul.f32 0.2, %v2165_v44  ;;  %v990_v17 = vpop.f32.mrb[55].mxu0  ;;  %v3087_v21 = vpop.f32.mrb[23].mxu1  ;;  %v3096_v3 = vsel %vm1572_vm13, %v1429_v2, %v1604_v42 }
 0x224   :  { %vm1061_vm15 = vcmp.ge.f32.partialorder %v990_v17, 0.0  ;;  %v1093_v45 = vmul.f32 0.2, %v990_v17  ;;  %vm1575_vm0 = vcmp.ge.f32.partialorder %v2221_v54, 0.0  ;;  %v1607_v14 = vmul.f32 0.2, %v2221_v54 }
 0x225   :  { %v1126_v5 = vsel %vm1062_vm14, %v2165_v44, %v1094_v57  ;;  %vm1574_vm5 = vcmp.ge.f32.partialorder %v3087_v21, 0.0  ;;  %v1606_v50 = vmul.f32 0.2, %v3087_v21 }
 0x226   :  { %v3099_v23 = vadd.f32 %v3071_v22, %v1126_v5  ;;  %v1125_v35 = vsel %vm1061_vm15, %v990_v17, %v1093_v45  ;;  %v2168_v9 = vpop.f32.mrb[56].mxu0  ;;  %v2224_v11 = vpop.f32.mrb[24].mxu1  ;;  %v1639_v49 = vsel %vm1575_vm0, %v2221_v54, %v1607_v14 }
 0x227   :  { %v3102_v46 = vadd.f32 %v3073_v29, %v1125_v35  ;;  %vm1064_vm1 = vcmp.ge.f32.partialorder %v2168_v9, 0.0  ;;  %v1096_v7 = vmul.f32 0.2, %v2168_v9  ;;  %v1000_v13 = vpop.f32.mrb[57].mxu0  ;;  %v1449_v6 = vpop.f32.mrb[25].mxu1  ;;  %vm1577_vm2 = vcmp.ge.f32.partialorder %v2224_v11, 0.0 }
 0x228   :  { %v1609_v58 = vmul.f32 0.2, %v2224_v11  ;;  %vm1063_vm3 = vcmp.ge.f32.partialorder %v1000_v13, 0.0  ;;  %v1095_v31 = vmul.f32 0.2, %v1000_v13  ;;  %vm1576_vm4 = vcmp.ge.f32.partialorder %v1449_v6, 0.0 }
 0x229   :  { %v1128_v19 = vsel %vm1064_vm1, %v2168_v9, %v1096_v7  ;;  %v1608_v22 = vmul.f32 0.2, %v1449_v6 }
 0x22a   :  { %v1152_v24 = vadd.f32 %v3075_v38, %v1128_v19  ;;  %v1641_v25 = vsel %vm1577_vm2, %v2224_v11, %v1609_v58  ;;  %v1127_v27 = vsel %vm1063_vm3, %v1000_v13, %v1095_v31  ;;  %v2171_v29 = vpop.f32.mrb[58].mxu0  ;;  %v2227_v30 = vpop.f32.mrb[26].mxu1 }
 0x22b   :  { %v3106_v32 = vadd.f32 %v1641_v25, %v1633_v26  ;;  %v1151_v34 = vadd.f32 %v3077_v43, %v1127_v27  ;;  %v1640_v36 = vsel %vm1576_vm4, %v1449_v6, %v1608_v22  ;;  %vm1066_vm6 = vcmp.ge.f32.partialorder %v2171_v29, 0.0  ;;  %v1010_v37 = vpop.f32.mrb[59].mxu0  ;;  %v1459_v39 = vpop.f32.mrb[27].mxu1 }
 0x22c   :  { %1160 = vst [vmem:[#allocation2 + $0x8] sm:$0xff] %v1152_v24  ;;  %v3109_v40 = vadd.f32 %v1640_v36, %v1632_v62  ;;  %v1098_v41 = vmul.f32 0.2, %v2171_v29  ;;  %vm1579_vm7 = vcmp.ge.f32.partialorder %v2227_v30, 0.0  ;;  %v1611_v47 = vmul.f32 0.2, %v2227_v30 }
 0x22d   :  { %1159 = vst [vmem:[#allocation2] sm:$0xff] %v1151_v34  ;;  %vm1065_vm8 = vcmp.ge.f32.partialorder %v1010_v37, 0.0  ;;  %v1097_v38 = vmul.f32 0.2, %v1010_v37  ;;  %vm1578_vm9 = vcmp.ge.f32.partialorder %v1459_v39, 0.0 }
 0x22e   :  { %v1610_v48 = vmul.f32 0.2, %v1459_v39  ;;  %v1130_v43 = vsel %vm1066_vm6, %v2171_v29, %v1098_v41  ;;  %v1643_v51 = vsel %vm1579_vm7, %v2227_v30, %v1611_v47  ;;  %v2174_v52 = vpop.f32.mrb[60].mxu0  ;;  %v2230_v53 = vpop.f32.mrb[28].mxu1 }
 0x22f   :  { %v1154_v59 = vadd.f32 %v3079_v55, %v1130_v43  ;;  %v3114_v60 = vadd.f32 %v1643_v51, %v1635_v28  ;;  %v1129_v61 = vsel %vm1065_vm8, %v1010_v37, %v1097_v38  ;;  %v1020_v1 = vpop.f32.mrb[61].mxu0  ;;  %v1469_v2 = vpop.f32.mrb[29].mxu1  ;;  %vm1068_vm10 = vcmp.ge.f32.partialorder %v2174_v52, 0.0 }
 0x230   :  { %v1642_v0 = vsel %vm1578_vm9, %v1459_v39, %v1610_v48  ;;  %v1153_v4 = vadd.f32 %v3081_v63, %v1129_v61  ;;  %v1100_v12 = vmul.f32 0.2, %v2174_v52  ;;  %vm1581_vm11 = vcmp.ge.f32.partialorder %v2230_v53, 0.0 }
 0x231   :  { %v3117_v8 = vadd.f32 %v1642_v0, %v1634_v15  ;;  %1162 = vst [vmem:[#allocation2 + $0x18] sm:$0xff] %v1154_v59  ;;  %v1613_v16 = vmul.f32 0.2, %v2230_v53  ;;  %vm1067_vm12 = vcmp.ge.f32.partialorder %v1020_v1, 0.0  ;;  %v1099_v20 = vmul.f32 0.2, %v1020_v1 }
 0x232   :  { %v1638_v55 = vsel %vm1574_vm5, %v3087_v21, %v1606_v50  ;;  %1161 = vst [vmem:[#allocation2 + $0x10] sm:$0xff] %v1153_v4  ;;  %v1132_v33 = vsel %vm1068_vm10, %v2174_v52, %v1100_v12  ;;  %vm1580_vm13 = vcmp.ge.f32.partialorder %v1469_v2, 0.0  ;;  %v1612_v42 = vmul.f32 0.2, %v1469_v2  ;;  %v2177_v44 = vpop.f32.mrb[62].mxu0  ;;  %v2233_v54 = vpop.f32.mrb[30].mxu1 }
 0x233   :  { %v1156_v63 = vadd.f32 %v3083_v18, %v1132_v33  ;;  %v1645_v57 = vsel %vm1581_vm11, %v2230_v53, %v1613_v16  ;;  %v1131_v17 = vsel %vm1067_vm12, %v1020_v1, %v1099_v20  ;;  %vm1070_vm14 = vcmp.ge.f32.partialorder %v2177_v44, 0.0  ;;  %v1030_v26 = vpop.f32.mrb[63].mxu0  ;;  %v1479_v45 = vpop.f32.mrb[31].mxu1 }
 0x234   :  { %v1669_v62 = vadd.f32 %v1645_v57, %v3094_v10  ;;  %v1155_v28 = vadd.f32 %v3085_v56, %v1131_v17  ;;  %v1644_v15 = vsel %vm1580_vm13, %v1469_v2, %v1612_v42  ;;  %v1102_v5 = vmul.f32 0.2, %v2177_v44 }
 0x235   :  { %1164 = vst [vmem:[#allocation2 + $0x28] sm:$0xff] %v1156_v63  ;;  %v1668_v21 = vadd.f32 %v1644_v15, %v3096_v3  ;;  %vm1583_vm15 = vcmp.ge.f32.partialorder %v2233_v54, 0.0  ;;  %v1615_v35 = vmul.f32 0.2, %v2233_v54  ;;  %vm1069_vm0 = vcmp.ge.f32.partialorder %v1030_v26, 0.0 }
 0x236   :  { %1163 = vst [vmem:[#allocation2 + $0x20] sm:$0xff] %v1155_v28  ;;  %v1134_v9 = vsel %vm1070_vm14, %v2177_v44, %v1102_v5  ;;  %v1101_v18 = vmul.f32 0.2, %v1030_v26  ;;  %vm1582_vm1 = vcmp.ge.f32.partialorder %v1479_v45, 0.0  ;;  %v1614_v11 = vmul.f32 0.2, %v1479_v45 }
 0x237   :  { %v2236_v7 = vpop.f32.mrb[32].mxu1  ;;  %v1158_v13 = vadd.f32 %v3099_v23, %v1134_v9  ;;  %v1647_v6 = vsel %vm1583_vm15, %v2233_v54, %v1615_v35 }
 0x238   :  { %vm1585_vm2 = vcmp.ge.f32.partialorder %v2236_v7, 0.0  ;;  %v1617_v10 = vmul.f32 0.2, %v2236_v7  ;;  %v1489_v56 = vpop.f32.mrb[33].mxu1  ;;  %v1671_v58 = vadd.f32 %v1647_v6, %v1639_v49  ;;  %v1133_v31 = vsel %vm1069_vm0, %v1030_v26, %v1101_v18 }
 0x239   :  { %v1646_v14 = vsel %vm1582_vm1, %v1479_v45, %v1614_v11  ;;  %vm1584_vm3 = vcmp.ge.f32.partialorder %v1489_v56, 0.0  ;;  %1166 = vst [vmem:[#allocation2 + $0x38] sm:$0xff] %v1158_v13  ;;  %v1157_v3 = vadd.f32 %v3102_v46, %v1133_v31  ;;  %v1616_v24 = vmul.f32 0.2, %v1489_v56 }
 0x23a   :  { %v1670_v19 = vadd.f32 %v1646_v14, %v1638_v55  ;;  %v1649_v22 = vsel %vm1585_vm2, %v2236_v7, %v1617_v10  ;;  %v2239_v27 = vpop.f32.mrb[34].mxu1 }
 0x23b   :  { %v1673_v25 = vadd.f32 %v3106_v32, %v1649_v22  ;;  %1165 = vst [vmem:[#allocation2 + $0x30] sm:$0xff] %v1157_v3  ;;  %v1648_v29 = vsel %vm1584_vm3, %v1489_v56, %v1616_v24  ;;  %vm1587_vm4 = vcmp.ge.f32.partialorder %v2239_v27, 0.0  ;;  %v1619_v23 = vmul.f32 0.2, %v2239_v27  ;;  %v1499_v30 = vpop.f32.mrb[35].mxu1 }
 0x23c   :  { %v1672_v34 = vadd.f32 %v3109_v40, %v1648_v29  ;;  %vm1586_vm5 = vcmp.ge.f32.partialorder %v1499_v30, 0.0  ;;  %v1618_v36 = vmul.f32 0.2, %v1499_v30 }
 0x23d   :  { %v1651_v37 = vsel %vm1587_vm4, %v2239_v27, %v1619_v23 }
 0x23e   :  { %v1675_v39 = vadd.f32 %v3114_v60, %v1651_v37  ;;  %v1650_v41 = vsel %vm1586_vm5, %v1499_v30, %v1618_v36  ;;  %v2242_v46 = vpop.f32.mrb[36].mxu1 }
 0x23f   :  { %v1674_v47 = vadd.f32 %v3117_v8, %v1650_v41  ;;  %vm1589_vm6 = vcmp.ge.f32.partialorder %v2242_v46, 0.0  ;;  %v1621_v38 = vmul.f32 0.2, %v2242_v46  ;;  %v1509_v32 = vpop.f32.mrb[37].mxu1 }
 0x240   :  { %vm1588_vm7 = vcmp.ge.f32.partialorder %v1509_v32, 0.0  ;;  %v1620_v48 = vmul.f32 0.2, %v1509_v32 }
 0x241   :  { %v1653_v49 = vsel %vm1589_vm6, %v2242_v46, %v1621_v38 }
 0x242   :  { %v1677_v50 = vadd.f32 %v1669_v62, %v1653_v49  ;;  %v1652_v43 = vsel %vm1588_vm7, %v1509_v32, %v1620_v48  ;;  %v2245_v51 = vpop.f32.mrb[38].mxu1 }
 0x243   :  { %v1676_v52 = vadd.f32 %v1668_v21, %v1652_v43  ;;  %vm1591_vm8 = vcmp.ge.f32.partialorder %v2245_v51, 0.0  ;;  %v1623_v40 = vmul.f32 0.2, %v2245_v51  ;;  %v1519_v53 = vpop.f32.mrb[39].mxu1 }
 0x244   :  { %vm1590_vm9 = vcmp.ge.f32.partialorder %v1519_v53, 0.0  ;;  %v1622_v59 = vmul.f32 0.2, %v1519_v53 }
 0x245   :  { %v1655_v60 = vsel %vm1591_vm8, %v2245_v51, %v1623_v40 }
 0x246   :  { %v1679_v61 = vadd.f32 %v1671_v58, %v1655_v60  ;;  %v1654_v0 = vsel %vm1590_vm9, %v1519_v53, %v1622_v59  ;;  %v2248_v1 = vpop.f32.mrb[40].mxu1 }
 0x247   :  { %v1678_v2 = vadd.f32 %v1670_v19, %v1654_v0  ;;  %vm1593_vm10 = vcmp.ge.f32.partialorder %v2248_v1, 0.0  ;;  %v1625_v4 = vmul.f32 0.2, %v2248_v1  ;;  %v1529_v8 = vpop.f32.mrb[41].mxu1 }
 0x248   :  { %vm1592_vm11 = vcmp.ge.f32.partialorder %v1529_v8, 0.0  ;;  %v1624_v12 = vmul.f32 0.2, %v1529_v8 }
 0x249   :  { %v1657_v16 = vsel %vm1593_vm10, %v2248_v1, %v1625_v4 }
 0x24a   :  { %v1681_v20 = vadd.f32 %v1673_v25, %v1657_v16  ;;  %v1656_v55 = vsel %vm1592_vm11, %v1529_v8, %v1624_v12  ;;  %v2251_v33 = vpop.f32.mrb[42].mxu1 }
 0x24b   :  { %v1680_v42 = vadd.f32 %v1672_v34, %v1656_v55  ;;  %vm1595_vm12 = vcmp.ge.f32.partialorder %v2251_v33, 0.0  ;;  %v1627_v44 = vmul.f32 0.2, %v2251_v33  ;;  %v1539_v54 = vpop.f32.mrb[43].mxu1 }
 0x24c   :  { %1690 = vst [vmem:[#allocation2 + $0x48] sm:$0xff] %v1681_v20  ;;  %vm1594_vm13 = vcmp.ge.f32.partialorder %v1539_v54, 0.0  ;;  %v1626_v63 = vmul.f32 0.2, %v1539_v54 }
 0x24d   :  { %1689 = vst [vmem:[#allocation2 + $0x40] sm:$0xff] %v1680_v42  ;;  %v1659_v57 = vsel %vm1595_vm12, %v2251_v33, %v1627_v44 }
 0x24e   :  { %v1683_v17 = vadd.f32 %v1675_v39, %v1659_v57  ;;  %v1658_v26 = vsel %vm1594_vm13, %v1539_v54, %v1626_v63  ;;  %v2254_v45 = vpop.f32.mrb[44].mxu1 }
 0x24f   :  { %v1682_v62 = vadd.f32 %v1674_v47, %v1658_v26  ;;  %vm1597_vm14 = vcmp.ge.f32.partialorder %v2254_v45, 0.0  ;;  %v1629_v28 = vmul.f32 0.2, %v2254_v45  ;;  %v1549_v15 = vpop.f32.mrb[45].mxu1 }
 0x250   :  { %1692 = vst [vmem:[#allocation2 + $0x58] sm:$0xff] %v1683_v17  ;;  %vm1596_vm15 = vcmp.ge.f32.partialorder %v1549_v15, 0.0  ;;  %v1628_v5 = vmul.f32 0.2, %v1549_v15 }
 0x251   :  { %1691 = vst [vmem:[#allocation2 + $0x50] sm:$0xff] %v1682_v62  ;;  %v1661_v21 = vsel %vm1597_vm14, %v2254_v45, %v1629_v28 }
 0x252   :  { %v1685_v35 = vadd.f32 %v1677_v50, %v1661_v21  ;;  %v1660_v9 = vsel %vm1596_vm15, %v1549_v15, %v1628_v5  ;;  %v2257_v18 = vpop.f32.mrb[46].mxu1 }
 0x253   :  { %v1684_v11 = vadd.f32 %v1676_v52, %v1660_v9  ;;  %vm1599_vm0 = vcmp.ge.f32.partialorder %v2257_v18, 0.0  ;;  %v1631_v7 = vmul.f32 0.2, %v2257_v18  ;;  %v1559_v13 = vpop.f32.mrb[47].mxu1 }
 0x254   :  { %1694 = vst [vmem:[#allocation2 + $0x68] sm:$0xff] %v1685_v35  ;;  %vm1598_vm1 = vcmp.ge.f32.partialorder %v1559_v13, 0.0  ;;  %v1630_v6 = vmul.f32 0.2, %v1559_v13 }
 0x255   :  { %1693 = vst [vmem:[#allocation2 + $0x60] sm:$0xff] %v1684_v11  ;;  %v1663_v10 = vsel %vm1599_vm0, %v2257_v18, %v1631_v7 }
 0x256   :  { %v1687_v56 = vadd.f32 %v1679_v61, %v1663_v10  ;;  %v1662_v58 = vsel %vm1598_vm1, %v1559_v13, %v1630_v6 }
 0x257   :  { %v1686_v31 = vadd.f32 %v1678_v2, %v1662_v58 }
 0x258   :  { %1696 = vst [vmem:[#allocation2 + $0x78] sm:$0xff] %v1687_v56 }
 0x259   :  { %1695 = vst [vmem:[#allocation2 + $0x70] sm:$0xff] %v1686_v31 }
 0x25a   :  { %2385 = shalt.err (!%p2382_p4)
}
 0x25b   :  { %s2386_s26 = scalar_lea.hbm %s3149_s5, 2048 }
 0x25c   :  { %p2387_p5 = scmp.ne.s32.totalorder %s3149_s5, %s2386_s26  ;;  %p2390_p6 = scmp.lt.u32.totalorder %s2386_s26, %s3149_s5 }
 0x25e   :  { %p2392_p7 = pnand %p2390_p6, %p2387_p5 }
 0x260   :  { %2395 = shalt.err (!%p2392_p7)
}
 0x261   :  { %s2400_s6 = smov 128   ;;  %s2401_s1 = smov 8  }
 0x262   :  { %1708 = dma.vmem_to_hbm [thread:$0]  %s1703_s4, 2048, %s3149_s5, [#allocation3], %s2400_s6, %s2400_s6, %s2401_s1  }
 0x263   :  { %2396 = dma.done.wait [#allocation3], 2048  }
 0x264   :  { %2397 = vsyncadd [#allocation3], 4294965248 }
 0x265   :  { %1712 = vsyncpa [#allocation3], 1 }

</bundles_post_ra>
